<compile_context>
chip_gen: v5e
topology: v5e:2x2
jax: 0.10.0
libtpu: 0.0.40
codegen_flags: <defaults>
</compile_context>

<pallas_src>
import jax
import jax.numpy as jnp
from jax.experimental import pallas as pl
from jax.experimental.pallas import tpu as pltpu


def _pick_tile(n, preferred, align):
    """Largest multiple of `align` that divides n and is <= preferred.

    Falls back to the full dimension (always a legal block size)."""
    cap = (min(preferred, n) // align) * align
    t = cap
    while t >= align:
        if n % t == 0:
            return t
        t -= align
    return n


def spgat_forward(x, adj, w, a, *, alpha=0.2, elu_alpha=1.0, concat=True,
                  block_rows=None, block_cols=None, proj_block_rows=None):
    """SpGAT_unit.forward for a single graph.

    x:   (N, D_in) node features
    adj: (N, N)    adjacency (only the nonzero pattern is used)
    w:   (D_in, F) projection weight
    a:   (1, 2F)   attention vector [a_src | a_dst]
    """
    x = x.astype(jnp.float32)
    w = w.astype(jnp.float32)
    a = a.astype(jnp.float32)

    n, d_in = x.shape
    f_out = w.shape[1]

    # Only the nonzero pattern of adj matters -> stream it as int8 (4x less
    # HBM than f32 for the dominant N^2-byte stream).
    adj_mask = (adj != 0).astype(jnp.int8)

    # ---- tile sizes --------------------------------------------------------
    # Row blocks: multiple of 8 sublanes.  Column (reduction) blocks: multiple
    # of 128 lanes.  Defaults sized for v7x (64 MiB VMEM); v6e/v5e can pass
    # larger block_cols (1024-2048) for more HBM efficiency.
    tn = block_rows if block_rows is not None else _pick_tile(n, 256, 8)
    if n % tn != 0 or (tn != n and tn % 8 != 0):
        tn = n
    tk = block_cols if block_cols is not None else _pick_tile(n, 1024, 128)
    if n % tk != 0 or (tk != n and tk % 128 != 0):
        tk = n
    tna = proj_block_rows if proj_block_rows is not None else tn
    if n % tna != 0 or (tna != n and tna % 8 != 0):
        tna = n

    # Fused projection weight: one MXU matmul yields h, f1 (= h @ a_src) and
    # f2 (= h @ a_dst) instead of one dense matmul + two 1-lane matmuls.
    wa1 = w @ a[0, :f_out]                                             # (D_in,)
    wa2 = w @ a[0, f_out:]                                             # (D_in,)
    w_full = jnp.concatenate([w, wa1[:, None], wa2[:, None]], axis=1)  # (D_in, F+2)

    # ---- Kernel A: fused projection  hf = x @ [W | W a_src | W a_dst] ------
    def proj_kernel(x_ref, wf_ref, h_ref, s_ref):
        hf = jnp.dot(x_ref[...], wf_ref[...],
                     preferred_element_type=jnp.float32)   # (tna, F+2)
        h_ref[...] = hf[:, :f_out]                          # projected features
        s_ref[...] = hf[:, f_out:]                          # [f1 | f2] per node

    h, s12 = pl.pallas_call(
        proj_kernel,
        out_shape=(jax.ShapeDtypeStruct((n, f_out), jnp.float32),
                   jax.ShapeDtypeStruct((n, 2), jnp.float32)),
        grid=(n // tna,),
        in_specs=[
            pl.BlockSpec((tna, d_in), lambda i: (i, 0)),         # x row block
            pl.BlockSpec((d_in, f_out + 2), lambda i: (0, 0)),   # fused weights
        ],
        out_specs=(
            pl.BlockSpec((tna, f_out), lambda i: (i, 0)),
            pl.BlockSpec((tna, 2), lambda i: (i, 0)),
        ),
        compiler_params=pltpu.CompilerParams(
            dimension_semantics=("parallel",)),
    )(x, w_full)

    # O(N)-byte layout plumbing (tiny XLA ops): a (N, 1) source-score column
    # and a lane-dense (1, N) destination-score row for kernel B's blocks.
    f1 = s12[:, 0:1]                       # (N, 1)
    f2_row = s12[:, 1].reshape(1, n)       # (1, N)

    # ---- Kernel B: masked attention + aggregation, tiled (rows x columns) --
    n_row_blocks = n // tn
    n_col_blocks = n // tk

    def attn_kernel(f1_ref, f2_ref, adj_ref, h_ref, o_ref, acc_ref, rsum_ref):
        k = pl.program_id(1)

        @pl.when(k == 0)
        def _init():
            acc_ref[...] = jnp.zeros_like(acc_ref)
            rsum_ref[...] = jnp.zeros_like(rsum_ref)

        s = f1_ref[...] + f2_ref[...]                        # (tn, tk) scores
        s = jnp.where(s > 0.0, s, alpha * s)                 # LeakyReLU
        # exp(-leakyrelu) on edges, exactly 0 elsewhere.  compare+select keeps
        # a non-edge exp overflow from becoming inf * 0 = NaN (the reference
        # never evaluates exp at non-edge positions).
        e = jnp.where(adj_ref[...] != 0, jnp.exp(-s), 0.0)

        rsum_ref[...] += jnp.sum(e, axis=1, keepdims=True)   # (tn, 1)
        acc_ref[...] += jnp.dot(e, h_ref[...],
                                preferred_element_type=jnp.float32)

        @pl.when(k == pl.num_programs(1) - 1)
        def _finalize():
            inv = 1.0 / (rsum_ref[...] + 1e-25)   # one divide per row, not per (row, feat)
            hp = acc_ref[...] * inv
            if concat:                             # F.elu(h_prime)
                hp = jnp.where(hp > 0.0, hp,
                               elu_alpha * (jnp.exp(jnp.minimum(hp, 0.0)) - 1.0))
            o_ref[...] = hp

    out = pl.pallas_call(
        attn_kernel,
        out_shape=jax.ShapeDtypeStruct((n, f_out), jnp.float32),
        grid=(n_row_blocks, n_col_blocks),
        in_specs=[
            pl.BlockSpec((tn, 1), lambda i, k: (i, 0)),       # f1 row block
            pl.BlockSpec((1, tk), lambda i, k: (0, k)),       # f2 column block
            pl.BlockSpec((tn, tk), lambda i, k: (i, k)),      # adjacency (int8)
            pl.BlockSpec((tk, f_out), lambda i, k: (k, 0)),   # h column block
        ],
        out_specs=pl.BlockSpec((tn, f_out), lambda i, k: (i, 0)),  # resident over k
        scratch_shapes=[pltpu.VMEM((tn, f_out), jnp.float32),      # e @ h accumulator
                        pltpu.VMEM((tn, 1), jnp.float32)],          # rowsum accumulator
        compiler_params=pltpu.CompilerParams(
            dimension_semantics=("parallel", "arbitrary")),
    )(f1, f2_row, adj_mask, h)
    return out


def reference_forward(x, adj, w, a, *, alpha=0.2, elu_alpha=1.0, concat=True):
    """Pure-JAX dense equivalent of SpGAT_unit.forward."""
    f_out = w.shape[1]
    h = x @ w
    f1 = h @ a[0, :f_out]                       # (N,)
    f2 = h @ a[0, f_out:]                       # (N,)
    s = f1[:, None] + f2[None, :]               # (N, N)
    s = jnp.where(s > 0.0, s, alpha * s)        # LeakyReLU
    e = jnp.where(adj != 0.0, jnp.exp(-s), 0.0)
    rowsum = jnp.sum(e, axis=1, keepdims=True) + 1e-25
    hp = (e @ h) / rowsum
    if concat:
        hp = jnp.where(hp > 0.0, hp,
                       elu_alpha * (jnp.exp(jnp.minimum(hp, 0.0)) - 1.0))
    return hp


if __name__ == "__main__":
    N, D_IN, F_OUT = 256, 64, 32
    ALPHA = 0.2

    key = jax.random.PRNGKey(0)
    kx, kw, ka, kadj = jax.random.split(key, 4)

    x = jax.random.normal(kx, (N, D_IN), jnp.float32)
    # xavier_normal_-style init with gain 1.414.
    w = jax.random.normal(kw, (D_IN, F_OUT), jnp.float32) * (
        1.414 * jnp.sqrt(2.0 / (D_IN + F_OUT)))
    a = jax.random.normal(ka, (1, 2 * F_OUT), jnp.float32) * (
        1.414 * jnp.sqrt(2.0 / (1 + 2 * F_OUT)))
    # Random sparse adjacency pattern with self-loops.
    adj = (jax.random.uniform(kadj, (N, N)) < 0.1).astype(jnp.float32)
    adj = jnp.maximum(adj, jnp.eye(N, dtype=jnp.float32))

    # Explicit small tiles so the demo exercises both the parallel row axis
    # (2 blocks) and the column-reduction accumulator (2 k-steps).
    out = spgat_forward(x, adj, w, a, alpha=ALPHA, concat=True,
                        block_rows=128, block_cols=128)
    out = jax.block_until_ready(out)

    ref = reference_forward(x, adj, w, a, alpha=ALPHA, concat=True)
    assert out.shape == (N, F_OUT)
    assert jnp.allclose(out, ref, atol=1e-4, rtol=1e-4), "mismatch vs JAX reference"

    print("KERNEL_OK")
</pallas_src>

<mosaic_0001>
module attributes {stable_mosaic.version = 11 : i64} {
  func.func @proj_kernel(%arg0: i32, %arg1: memref<128x64xf32, #tpu.memory_space<vmem>>, %arg2: memref<64x34xf32, #tpu.memory_space<vmem>>, %arg3: memref<128x32xf32, #tpu.memory_space<vmem>>, %arg4: memref<128x2xf32, #tpu.memory_space<vmem>>) attributes {dimension_semantics = [#tpu.dimension_semantics<parallel>], iteration_bounds = array<i64: 2>, scalar_prefetch = 0 : i64, scratch_operands = 0 : i64, tpu.core_type = #tpu.core_type<tc>, window_params = [{transform_indices = @transform_0, window_bounds = array<i64: 128, 64>}, {pipeline_mode = #tpu.pipeline_mode<synchronous>, transform_indices = @transform_1, window_bounds = array<i64: 64, 34>}, {transform_indices = @transform_2, window_bounds = array<i64: 128, 32>}, {transform_indices = @transform_3, window_bounds = array<i64: 128, 2>}]} {
    %c0 = arith.constant 0 : index
    %c0_0 = arith.constant 0 : index
    %0 = vector.load %arg1[%c0, %c0_0] : memref<128x64xf32, #tpu.memory_space<vmem>>, vector<128x64xf32>
    %c0_1 = arith.constant 0 : index
    %c0_2 = arith.constant 0 : index
    %1 = vector.load %arg2[%c0_1, %c0_2] : memref<64x34xf32, #tpu.memory_space<vmem>>, vector<64x34xf32>
    %cst = arith.constant dense<0.000000e+00> : vector<128x34xf32>
    %2 = tpu.matmul %0, %1, %cst {dimension_numbers = #tpu.dot_dimension_numbers<[1], [0], [0], [1], [0, 0, 1, 1], [], []>} : vector<128x64xf32>, vector<64x34xf32>, vector<128x34xf32> -> vector<128x34xf32>
    %3 = vector.extract_strided_slice %2 {offsets = [0, 0], sizes = [128, 32], strides = [1, 1]} : vector<128x34xf32> to vector<128x32xf32>
    %c0_3 = arith.constant 0 : index
    %c0_4 = arith.constant 0 : index
    %4 = vector.load %arg3[%c0_3, %c0_4] : memref<128x32xf32, #tpu.memory_space<vmem>>, vector<128x32xf32>
    tpu.vector_store %arg3[%c0_3, %c0_4], %3 {strides = array<i32>} : memref<128x32xf32, #tpu.memory_space<vmem>>, vector<128x32xf32>,
    %5 = vector.extract_strided_slice %2 {offsets = [0, 32], sizes = [128, 2], strides = [1, 1]} : vector<128x34xf32> to vector<128x2xf32>
    %c0_5 = arith.constant 0 : index
    %c0_6 = arith.constant 0 : index
    %6 = vector.load %arg4[%c0_5, %c0_6] : memref<128x2xf32, #tpu.memory_space<vmem>>, vector<128x2xf32>
    tpu.vector_store %arg4[%c0_5, %c0_6], %5 {strides = array<i32>} : memref<128x2xf32, #tpu.memory_space<vmem>>, vector<128x2xf32>,
    return
  }
  func.func @transform_0(%arg0: i32) -> (i32, i32) {
    %c0_i32 = arith.constant 0 : i32
    %c0_i32_0 = arith.constant 0 : i32
    return %arg0, %c0_i32 : i32, i32
  }
  func.func @transform_1(%arg0: i32) -> (i32, i32) {
    %c0_i32 = arith.constant 0 : i32
    %c0_i32_0 = arith.constant 0 : i32
    %c0_i32_1 = arith.constant 0 : i32
    return %c0_i32, %c0_i32_0 : i32, i32
  }
  func.func @transform_2(%arg0: i32) -> (i32, i32) {
    %c0_i32 = arith.constant 0 : i32
    %c0_i32_0 = arith.constant 0 : i32
    return %arg0, %c0_i32 : i32, i32
  }
  func.func @transform_3(%arg0: i32) -> (i32, i32) {
    %c0_i32 = arith.constant 0 : i32
    %c0_i32_0 = arith.constant 0 : i32
    return %arg0, %c0_i32 : i32, i32
  }
}

</mosaic_0001>

<bundles_post_ra>
// kernel: tpu_custom_call.1
= control target key start
LH: loop header
LB: loop body
LE: loop exit
PB: predicated region body
PF: predicated region fallthrough
CT: control target
= control target key end

     0   :  { %s605_s12 = smov 0   ;;  %s772_s0 = inlined_call_operand.vmem [shape: f32[256,64], index: 0, kind: input, shape index: {}]   ;;  %s773_s1 = inlined_call_operand.vmem [shape: f32[64,34], index: 1, kind: input, shape index: {}]   ;;  %s774_s2 = inlined_call_operand.vmem [shape: f32[256,32], index: 2, kind: output, shape index: {0}]   ;;  %s775_s3 = inlined_call_operand.vmem [shape: f32[256,2], index: 3, kind: output, shape index: {1}]  }
   0x1 LB: > { %s514_s13 = sadd.s32 4294967295, %s582_s12   ;;  %p518_p0 = scmp.ge.s32.totalorder %s582_s12, 1  ;;  %s582_s12 = sphi %s605_s12, %s14_s12  }
   0x2   : > { %p141_p1 = scmp.lt.s32.totalorder %s582_s12, 3 }
   0x4   : > { %p142_p2 = pnand %p518_p0, %p141_p1 }
   0x5   : > { %s519_s18 = sshll.u32 (!%p142_p2), %s514_s13, 4  ;;  %s584_s11 = smov (!%p142_p2), 96  }
   0x6   : > { %145 = sbr.rel (%p142_p2) target bundleno = 317 (0x13d), region = 28  ;;  %p171_p3 = scmp.lt.s32.totalorder (!%p142_p2), %s519_s18, 31 }
   0xb   : > { %v211_v0 = vld [vmem:[%s773_s1 + $0x38] sm:$0xff]  ;;  %v210_v1 = vld [vmem:[%s773_s1 + $0x30] sm:$0xff]  ;;  %v209_v2 = vld [vmem:[%s773_s1 + $0x28] sm:$0xff]  ;;  %s777_s18 = smov (!%p171_p3, %s519_s18), 31  ;;  %vm212_vm0 = vcmask 523264   ;;  %vm326_vm1 = vcmask 261120  }
   0xc   : > { %269 = vmatpush.msra.mxu0 %v211_v0  ;;  %543 = vmatpush.msra.mxu1 %v211_v0  ;;  %v208_v3 = vld [vmem:[%s773_s1 + $0x20] sm:$0xff]  ;;  %v207_v4 = vld [vmem:[%s773_s1 + $0x18] sm:$0xff]  ;;  %s628_s25 = sshll.u32 %s777_s18, 3  ;;  %v206_v5 = vld [vmem:[%s773_s1 + $0x10] sm:$0xff]  ;;  %vm407_vm2 = vcmask 15360  }
   0xd   : > { %544 = vmatpush.msra.mxu2 %v211_v0  ;;  %545 = vmatpush.msra.mxu3 %v211_v0  ;;  %v205_v6 = vld [vmem:[%s773_s1 + $0x8] sm:$0xff]  ;;  %s640_s5 = scalar_lea.vmem %s772_s0, %s628_s25  ;;  %v204_v7 = vld [vmem:[%s773_s1] sm:$0xff]  ;;  %s681_s10 = scalar_lea.vmem %s774_s2, %s628_s25 }
   0xe   : > { %270 = vmatpush.msra.mxu0 %v210_v1  ;;  %546 = vmatpush.msra.mxu1 %v210_v1  ;;  %v188_v8 = vld [vmem:[%s640_s5] sm:$0xff]  ;;  %v189_v12 = vld [vmem:[%s640_s5 + $0x8] sm:$0xff]  ;;  %v190_v16 = vld [vmem:[%s640_s5 + $0x10] sm:$0xff]  ;;  %s735_s15 = scalar_lea.vmem %s775_s3, %s628_s25 }
   0xf   : > { %547 = vmatpush.msra.mxu2 %v210_v1  ;;  %548 = vmatpush.msra.mxu3 %v210_v1  ;;  %v192_v9 = vld [vmem:[%s640_s5 + $0x20] sm:$0xff]  ;;  %v193_v13 = vld [vmem:[%s640_s5 + $0x28] sm:$0xff]  ;;  %v194_v17 = vld [vmem:[%s640_s5 + $0x30] sm:$0xff] }
  0x10   : > { %271 = vmatpush.msra.mxu0 %v209_v2  ;;  %549 = vmatpush.msra.mxu1 %v209_v2  ;;  %v196_v10 = vld [vmem:[%s640_s5 + $0x40] sm:$0xff]  ;;  %v197_v14 = vld [vmem:[%s640_s5 + $0x48] sm:$0xff]  ;;  %v198_v18 = vld [vmem:[%s640_s5 + $0x50] sm:$0xff] }
  0x11   : > { %550 = vmatpush.msra.mxu2 %v209_v2  ;;  %551 = vmatpush.msra.mxu3 %v209_v2  ;;  %v200_v11 = vld [vmem:[%s640_s5 + $0x60] sm:$0xff]  ;;  %v201_v15 = vld [vmem:[%s640_s5 + $0x68] sm:$0xff]  ;;  %v202_v19 = vld [vmem:[%s640_s5 + $0x70] sm:$0xff] }
  0x12   : > { %272 = vmatpush.msra.mxu0 %v208_v3  ;;  %552 = vmatpush.msra.mxu1 %v208_v3  ;;  %v191_v20 = vld [vmem:[%s640_s5 + $0x18] sm:$0xff] }
  0x13   : > { %553 = vmatpush.msra.mxu2 %v208_v3  ;;  %554 = vmatpush.msra.mxu3 %v208_v3  ;;  %v195_v21 = vld [vmem:[%s640_s5 + $0x38] sm:$0xff] }
  0x14   : > { %273 = vmatpush.msra.mxu0 %v207_v4  ;;  %555 = vmatpush.msra.mxu1 %v207_v4  ;;  %v199_v22 = vld [vmem:[%s640_s5 + $0x58] sm:$0xff] }
  0x15   : > { %556 = vmatpush.msra.mxu2 %v207_v4  ;;  %557 = vmatpush.msra.mxu3 %v207_v4  ;;  %v203_v23 = vld [vmem:[%s640_s5 + $0x78] sm:$0xff] }
  0x16   : > { %274 = vmatpush.msra.mxu0 %v206_v5  ;;  %558 = vmatpush.msra.mxu1 %v206_v5 }
  0x17   : > { %559 = vmatpush.msra.mxu2 %v206_v5  ;;  %560 = vmatpush.msra.mxu3 %v206_v5 }
  0x18   : > { %275 = vmatpush.msra.mxu0 %v205_v6  ;;  %561 = vmatpush.msra.mxu1 %v205_v6 }
  0x19   : > { %562 = vmatpush.msra.mxu2 %v205_v6  ;;  %563 = vmatpush.msra.mxu3 %v205_v6 }
  0x1a   : > { %276 = vmatpush.msra.mxu0 %v204_v7  ;;  %564 = vmatpush.msra.mxu1 %v204_v7 }
  0x1b   : > { %525 = vmatmul.msk.f32.vlgmr.msra.gmra.mxu0 %vm212_vm0, %v188_v8  ;;  %529 = vmatmul.msk.f32.vlgmr.msra.gmra.mxu1 %vm212_vm0, %v192_v9 }
  0x1c   : > { %565 = vmatpush.msra.mxu2 %v204_v7  ;;  %566 = vmatpush.msra.mxu3 %v204_v7 }
  0x1d   : > { %533 = vmatmul.msk.f32.vlgmr.msra.gmra.mxu2 %vm212_vm0, %v196_v10  ;;  %537 = vmatmul.msk.f32.vlgmr.msra.gmra.mxu3 %vm212_vm0, %v200_v11 }
  0x23   : > { %526 = vmatmul.msk.f32.gmra.mxu0 %vm212_vm0, %v189_v12  ;;  %530 = vmatmul.msk.f32.gmra.mxu1 %vm212_vm0, %v193_v13 }
  0x25   : > { %534 = vmatmul.msk.f32.gmra.mxu2 %vm212_vm0, %v197_v14  ;;  %538 = vmatmul.msk.f32.gmra.mxu3 %vm212_vm0, %v201_v15 }
  0x2b   : > { %527 = vmatmul.msk.f32.gmra.mxu0 %vm212_vm0, %v190_v16  ;;  %531 = vmatmul.msk.f32.gmra.mxu1 %vm212_vm0, %v194_v17 }
  0x2d   : > { %535 = vmatmul.msk.f32.gmra.mxu2 %vm212_vm0, %v198_v18  ;;  %539 = vmatmul.msk.f32.gmra.mxu3 %vm212_vm0, %v202_v19 }
  0x33   : > { %528 = vmatmul.msk.f32.gmra.mxu0 %vm212_vm0, %v191_v20  ;;  %532 = vmatmul.msk.f32.gmra.mxu1 %vm212_vm0, %v195_v21 }
  0x35   : > { %536 = vmatmul.msk.f32.gmra.mxu2 %vm212_vm0, %v199_v22  ;;  %540 = vmatmul.msk.f32.gmra.mxu3 %vm212_vm0, %v203_v23 }
  0x98   : > { %v278_v24 = vpop.f32.mrf.mxu0  ;;  %v290_v25 = vpop.f32.mrf.mxu1 }
  0x99   : > { %327 = vst.msk [vmem:[%s681_s10] sm:$0xff] %vm326_vm1, %v278_v24  ;;  %367 = vrot.lane.b32.xlu2 %v290_v25, %s584_s11  ;;  %359 = vrot.lane.b32.xlu0 %v278_v24, %s584_s11 }
  0x9a   : > { %331 = vst.msk [vmem:[%s681_s10 + $0x20] sm:$0xff] %vm326_vm1, %v290_v25 }
  0xa0   : > { %v281_v26 = vpop.f32.mrf.mxu0  ;;  %v302_v27 = vpop.f32.mrf.mxu2 }
  0xa1   : > { %328 = vst.msk [vmem:[%s681_s10 + $0x8] sm:$0xff] %vm326_vm1, %v281_v26  ;;  %v314_v28 = vpop.f32.mrf.mxu3  ;;  %375 = vrot.lane.b32.xlu2 %v302_v27, %s584_s11  ;;  %v293_v29 = vpop.f32.mrf.mxu1 }
  0xa2   : > { %335 = vst.msk [vmem:[%s681_s10 + $0x40] sm:$0xff] %vm326_vm1, %v302_v27  ;;  %383 = vrot.lane.b32.xlu0 %v314_v28, %s584_s11 }
  0xa3   : > { %339 = vst.msk [vmem:[%s681_s10 + $0x60] sm:$0xff] %vm326_vm1, %v314_v28 }
  0xa4   : > { %332 = vst.msk [vmem:[%s681_s10 + $0x28] sm:$0xff] %vm326_vm1, %v293_v29 }
  0xa8   : > { %v284_v30 = vpop.f32.mrf.mxu0  ;;  %v305_v31 = vpop.f32.mrf.mxu2 }
  0xa9   : > { %329 = vst.msk [vmem:[%s681_s10 + $0x10] sm:$0xff] %vm326_vm1, %v284_v30  ;;  %363 = vrot.lane.b32.xlu1 %v284_v30, %s584_s11  ;;  %369 = vrot.lane.b32.xlu2 %v293_v29, %s584_s11  ;;  %v296_v32 = vpop.f32.mrf.mxu1  ;;  %v317_v33 = vpop.f32.mrf.mxu3 }
  0xaa   : > { %336 = vst.msk [vmem:[%s681_s10 + $0x48] sm:$0xff] %vm326_vm1, %v305_v31  ;;  %361 = vrot.lane.b32.xlu0 %v281_v26, %s584_s11 }
  0xab   : > { %333 = vst.msk [vmem:[%s681_s10 + $0x30] sm:$0xff] %vm326_vm1, %v296_v32 }
  0xac   : > { %340 = vst.msk [vmem:[%s681_s10 + $0x68] sm:$0xff] %vm326_vm1, %v317_v33 }
  0xb0   : > { %v308_v34 = vpop.f32.mrf.mxu2  ;;  %v287_v35 = vpop.f32.mrf.mxu0 }
  0xb1   : > { %337 = vst.msk [vmem:[%s681_s10 + $0x50] sm:$0xff] %vm326_vm1, %v308_v34  ;;  %379 = vrot.lane.b32.xlu1 %v308_v34, %s584_s11  ;;  %v299_v36 = vpop.f32.mrf.mxu1  ;;  %v320_v37 = vpop.f32.mrf.mxu3 }
  0xb2   : > { %377 = vrot.lane.b32.xlu0 %v305_v31, %s584_s11  ;;  %330 = vst.msk [vmem:[%s681_s10 + $0x18] sm:$0xff] %vm326_vm1, %v287_v35 }
  0xb3   : > { %334 = vst.msk [vmem:[%s681_s10 + $0x38] sm:$0xff] %vm326_vm1, %v299_v36 }
  0xb4   : > { %341 = vst.msk [vmem:[%s681_s10 + $0x70] sm:$0xff] %vm326_vm1, %v320_v37 }
  0xb8   : > { %v311_v38 = vpop.f32.mrf.mxu2 }
  0xb9   : > { %338 = vst.msk [vmem:[%s681_s10 + $0x58] sm:$0xff] %vm326_vm1, %v311_v38  ;;  %381 = vrot.lane.b32.xlu2 %v311_v38, %s584_s11  ;;  %365 = vrot.lane.b32.xlu1 %v287_v35, %s584_s11  ;;  %v323_v39 = vpop.f32.mrf.mxu3 }
  0xba   : > { %371 = vrot.lane.b32.xlu0 %v296_v32, %s584_s11  ;;  %342 = vst.msk [vmem:[%s681_s10 + $0x78] sm:$0xff] %vm326_vm1, %v323_v39 }
  0xc1   : > { %387 = vrot.lane.b32.xlu2 %v320_v37, %s584_s11  ;;  %373 = vrot.lane.b32.xlu1 %v299_v36, %s584_s11 }
  0xc2   : > { %389 = vrot.lane.b32.xlu0 %v323_v39, %s584_s11 }
  0xc9   : > { %385 = vrot.lane.b32.xlu1 %v317_v33, %s584_s11 }
  0xf3   : > { %v368_v40 = vpop.permute.xlu2 %367 }
  0xf4   : > { %412 = vst.msk [vmem:[%s735_s15 + $0x20] sm:$0xff] %vm407_vm2, %v368_v40 }
  0xfb   : > { %v376_v41 = vpop.permute.xlu2 %375 }
  0xfc   : > { %416 = vst.msk [vmem:[%s735_s15 + $0x40] sm:$0xff] %vm407_vm2, %v376_v41 }
 0x103   : > { %v370_v42 = vpop.permute.xlu2 %369 }
 0x104   : > { %413 = vst.msk [vmem:[%s735_s15 + $0x28] sm:$0xff] %vm407_vm2, %v370_v42 }
 0x10b   : > { %v360_v43 = vpop.permute.xlu0 %359 }
 0x10c   : > { %408 = vst.msk [vmem:[%s735_s15] sm:$0xff] %vm407_vm2, %v360_v43 }
 0x113   : > { %v382_v44 = vpop.permute.xlu2 %381 }
 0x114   : > { %419 = vst.msk [vmem:[%s735_s15 + $0x58] sm:$0xff] %vm407_vm2, %v382_v44  ;;  %v384_v45 = vpop.permute.xlu0 %383 }
 0x115   : > { %420 = vst.msk [vmem:[%s735_s15 + $0x60] sm:$0xff] %vm407_vm2, %v384_v45 }
 0x11b   : > { %v388_v46 = vpop.permute.xlu2 %387  ;;  %v364_v47 = vpop.permute.xlu1 %363 }
 0x11c   : > { %422 = vst.msk [vmem:[%s735_s15 + $0x70] sm:$0xff] %vm407_vm2, %v388_v46  ;;  %v362_v48 = vpop.permute.xlu0 %361 }
 0x11d   : > { %409 = vst.msk [vmem:[%s735_s15 + $0x8] sm:$0xff] %vm407_vm2, %v362_v48 }
 0x11e   : > { %410 = vst.msk [vmem:[%s735_s15 + $0x10] sm:$0xff] %vm407_vm2, %v364_v47 }
 0x123   : > { %v380_v49 = vpop.permute.xlu1 %379 }
 0x124   : > { %v378_v50 = vpop.permute.xlu0 %377  ;;  %418 = vst.msk [vmem:[%s735_s15 + $0x50] sm:$0xff] %vm407_vm2, %v380_v49 }
 0x125   : > { %417 = vst.msk [vmem:[%s735_s15 + $0x48] sm:$0xff] %vm407_vm2, %v378_v50 }
 0x12b   : > { %v366_v51 = vpop.permute.xlu1 %365 }
 0x12c   : > { %v372_v52 = vpop.permute.xlu0 %371  ;;  %411 = vst.msk [vmem:[%s735_s15 + $0x18] sm:$0xff] %vm407_vm2, %v366_v51 }
 0x12d   : > { %414 = vst.msk [vmem:[%s735_s15 + $0x30] sm:$0xff] %vm407_vm2, %v372_v52 }
 0x133   : > { %v374_v53 = vpop.permute.xlu1 %373 }
 0x134   : > { %415 = vst.msk [vmem:[%s735_s15 + $0x38] sm:$0xff] %vm407_vm2, %v374_v53  ;;  %v390_v54 = vpop.permute.xlu0 %389 }
 0x135   : > { %423 = vst.msk [vmem:[%s735_s15 + $0x78] sm:$0xff] %vm407_vm2, %v390_v54 }
 0x13b   : > { %v386_v55 = vpop.permute.xlu1 %385 }
 0x13c   : > { %421 = vst.msk [vmem:[%s735_s15 + $0x68] sm:$0xff] %vm407_vm2, %v386_v55 }
 0x13d PF: > { %s14_s12 = sadd.s32 1, %s582_s12  }
 0x13e   : > { %p11_p4 = scmp.ge.s32.totalorder %s14_s12, 4  }
 0x140   :  { %13 = sbr.rel (!%p11_p4) target bundleno = 1 (0x1), region = 70 }

</bundles_post_ra>
